<compile_context>
chip_gen: v5e
topology: v5e:2x2
jax: 0.10.0
libtpu: 0.0.40
codegen_flags: <defaults>
</compile_context>

<pallas_src>
import functools

import jax
import jax.numpy as jnp
from jax.experimental import pallas as pl
from jax.experimental.pallas import tpu as pltpu


# ----------------------------------------------------------------------------
# Fused (log-)softmax kernel over the vocab axis.
# ----------------------------------------------------------------------------
def _normalized_probs_kernel(x_ref, o_ref, *, log_probs):
    x_native = x_ref[...]                                        # (TM, V) native dtype
    # Row max in the native dtype (max is a compare -> exact even in bf16);
    # upcast only at the exp/sum stage to halve pre-exp vreg pressure.
    m = jnp.max(x_native, axis=-1, keepdims=True).astype(jnp.float32)
    shifted = x_native.astype(jnp.float32) - m                   # f32 accumulation
    ex = jnp.exp(shifted)
    denom = jnp.sum(ex, axis=-1, keepdims=True)
    if log_probs:
        out = shifted - jnp.log(denom)
    else:
        out = ex / denom  # exact division: free in a memory-bound kernel
    o_ref[...] = out.astype(o_ref.dtype)


# ----------------------------------------------------------------------------
# Generation-aware VMEM budget + row-tile sizing.
# ----------------------------------------------------------------------------
def _vmem_capacity_bytes():
    """Physical per-core VMEM; conservative 64 MiB (v7x) fallback if unknown."""
    try:
        info = pltpu.get_tpu_info()
        cap = int(getattr(info, "vmem_capacity_bytes", 0))
        if cap > 0:
            return cap
    except Exception:
        pass
    return 64 * 1024 * 1024


_TARGET_BLOCK_BYTES = 4 * 1024 * 1024  # ~4 MiB input block -> ~16 MiB resident @ f32


def _choose_row_tile(rows, v, itemsize, vmem_budget):
    """Rows per block: sized by target block bytes, capped by the VMEM budget."""
    vp = ((v + 127) // 128) * 128  # lane-padded width governs VMEM residency
    tm = _TARGET_BLOCK_BYTES // max(vp * itemsize, 1)
    # 2x-buffered input + 2x-buffered output + ~4 f32 temps per row.
    per_row = vp * (2 * itemsize + 2 * itemsize + 4 * 4)
    tm = min(tm, vmem_budget // max(per_row, 1))
    if tm >= rows:
        return rows                      # full extent: always a legal block shape
    return max(8, (tm // 8) * 8)         # otherwise a multiple of 8 (sublane rule)


# ----------------------------------------------------------------------------
# Wrapper: (log-)softmax over the vocab axis of a (T, B, V) decoder output.
# ----------------------------------------------------------------------------
def pallas_get_normalized_probs(net_out, log_probs):
    T, B, V = net_out.shape
    dtype = net_out.dtype
    rows = T * B

    vmem_cap = _vmem_capacity_bytes()
    vmem_limit = (vmem_cap * 3) // 4      # ~48 MiB on v7x, ~96 MiB on v5e/v6e
    tm = _choose_row_tile(rows, V, jnp.dtype(dtype).itemsize, vmem_limit)

    x2 = net_out.reshape(rows, V)         # contiguous -> metadata-only reshape

    kernel = functools.partial(_normalized_probs_kernel, log_probs=log_probs)
    out = pl.pallas_call(
        kernel,
        out_shape=jax.ShapeDtypeStruct((rows, V), dtype),
        grid=(pl.cdiv(rows, tm),),
        in_specs=[pl.BlockSpec((tm, V), lambda i: (i, 0))],
        out_specs=pl.BlockSpec((tm, V), lambda i: (i, 0)),
        compiler_params=pltpu.CompilerParams(
            # TODO(synk): on v7x (2 TensorCores/chip) pltpu.CORE_PARALLEL on this
            # axis would split rows across both cores (~2x EUP/VPU); kept
            # "parallel" so the identical code compiles on single-TC v5e/v6e.
            dimension_semantics=("parallel",),
            vmem_limit_bytes=vmem_limit,
        ),
    )(x2)

    return out.reshape(T, B, V)           # contiguous -> metadata-only reshape


# ----------------------------------------------------------------------------
# JAX-side equivalent of FakeDecoderModel
# ----------------------------------------------------------------------------
class FakeDecoderModel:
    """Wraps a stored net_out / target, mirroring the PyTorch module."""

    def __init__(self, net_out, target):
        self.net_out = net_out
        self.target = target

    def forward(self, **unused):
        # PyTorch: `return self.net_out` -- pure pass-through, zero HBM traffic.
        return self.net_out

    def __call__(self, **unused):
        return self.forward(**unused)

    def get_normalized_probs(self, net_output, log_probs, sample=None):
        # The PyTorch module delegates to the wrapped model; here normalization
        # is implemented directly as a fused Pallas (log-)softmax kernel.
        return pallas_get_normalized_probs(net_output, log_probs)

    def get_targets(self, *unused):
        return self.target

    # TODO(synk): `.decoder` delegates to the wrapped fairseq model's decoder
    # submodule; an opaque submodule has no Pallas equivalent.


# ----------------------------------------------------------------------------
# Demo / smoke test
# ----------------------------------------------------------------------------
if __name__ == "__main__":
    key = jax.random.PRNGKey(0)
    k1, k2 = jax.random.split(key)

    T, B, V = 8, 2, 32          # seq len, batch, vocab (small, deterministic)
    L = 6                       # target length

    net_out = jax.random.normal(k1, (T, B, V), dtype=jnp.float32)
    target = jax.random.randint(k2, (B, L), 0, V, dtype=jnp.int32)

    fake = FakeDecoderModel(net_out, target)

    # forward(): returns net_out unchanged (exact pass-through semantics).
    out = fake()
    assert out.shape == (T, B, V) and out.dtype == net_out.dtype
    assert bool(jnp.array_equal(out, net_out))

    # get_targets(): returns the stored target unchanged.
    tgt = fake.get_targets()
    assert bool(jnp.array_equal(tgt, target))

    # get_normalized_probs(log_probs=True): log-softmax over vocab.
    lp = jax.block_until_ready(fake.get_normalized_probs(out, log_probs=True))
    ref_lp = jax.nn.log_softmax(net_out.astype(jnp.float32), axis=-1)
    assert lp.shape == (T, B, V) and lp.dtype == net_out.dtype
    assert bool(jnp.allclose(lp, ref_lp, atol=1e-5, rtol=1e-5))

    # get_normalized_probs(log_probs=False): softmax over vocab (exact division).
    p = jax.block_until_ready(fake.get_normalized_probs(out, log_probs=False))
    ref_p = jax.nn.softmax(net_out.astype(jnp.float32), axis=-1)
    assert bool(jnp.allclose(p, ref_p, atol=1e-5, rtol=1e-5))

    print("KERNEL_OK")
</pallas_src>

<mosaic_0001>
module attributes {stable_mosaic.version = 11 : i64} {
  func.func @_normalized_probs_kernel(%arg0: i32, %arg1: memref<16x32xf32, #tpu.memory_space<vmem>>, %arg2: memref<16x32xf32, #tpu.memory_space<vmem>>) attributes {dimension_semantics = [#tpu.dimension_semantics<parallel>], iteration_bounds = array<i64: 1>, scalar_prefetch = 0 : i64, scratch_operands = 0 : i64, tpu.core_type = #tpu.core_type<tc>, window_params = [{transform_indices = @transform_0, window_bounds = array<i64: 16, 32>}, {transform_indices = @transform_1, window_bounds = array<i64: 16, 32>}]} {
    %c0 = arith.constant 0 : index
    %c0_0 = arith.constant 0 : index
    %0 = vector.load %arg1[%c0, %c0_0] : memref<16x32xf32, #tpu.memory_space<vmem>>, vector<16x32xf32>
    %cst = arith.constant dense<0xFF800000> : vector<16xf32>
    %1 = vector.multi_reduction <maximumf>, %0, %cst [1] : vector<16x32xf32> to vector<16xf32>
    %2 = vector.shape_cast %1 : vector<16xf32> to vector<16x1xf32>
    %3 = vector.broadcast %2 : vector<16x1xf32> to vector<16x32xf32>
    %4 = arith.subf %0, %3 : vector<16x32xf32>
    %5 = math.exp %4 : vector<16x32xf32>
    %cst_1 = arith.constant dense<0.000000e+00> : vector<16xf32>
    %6 = vector.multi_reduction <add>, %5, %cst_1 [1] : vector<16x32xf32> to vector<16xf32>
    %7 = vector.shape_cast %6 : vector<16xf32> to vector<16x1xf32>
    %8 = math.log %7 : vector<16x1xf32>
    %9 = vector.broadcast %8 : vector<16x1xf32> to vector<16x32xf32>
    %10 = arith.subf %4, %9 : vector<16x32xf32>
    %c0_2 = arith.constant 0 : index
    %c0_3 = arith.constant 0 : index
    %11 = vector.load %arg2[%c0_2, %c0_3] : memref<16x32xf32, #tpu.memory_space<vmem>>, vector<16x32xf32>
    tpu.vector_store %arg2[%c0_2, %c0_3], %10 {strides = array<i32>} : memref<16x32xf32, #tpu.memory_space<vmem>>, vector<16x32xf32>,
    return
  }
  func.func @transform_0(%arg0: i32) -> (i32, i32) {
    %c0_i32 = arith.constant 0 : i32
    %c0_i32_0 = arith.constant 0 : i32
    return %arg0, %c0_i32 : i32, i32
  }
  func.func @transform_1(%arg0: i32) -> (i32, i32) {
    %c0_i32 = arith.constant 0 : i32
    %c0_i32_0 = arith.constant 0 : i32
    return %arg0, %c0_i32 : i32, i32
  }
}

</mosaic_0001>

<bundles_post_ra>
// kernel: tpu_custom_call.1
= control target key start
LH: loop header
LB: loop body
LE: loop exit
PB: predicated region body
PF: predicated region fallthrough
CT: control target
= control target key end

     0   :  { %6 = vsyncpa [#allocation3], 0  ;;  %s169_s0 = inlined_call_operand.hbm [shape: f32[16,32], index: 0, kind: input, shape index: {}]   ;;  %s170_s1 = inlined_call_operand.hbm [shape: f32[16,32], index: 1, kind: output, shape index: {}]  }
   0x1   :  { %7 = vsyncpa [#allocation4], 0  ;;  %s12_s8 = sshll.u32 %s169_s0, 4  ;;  %s137_s9 = smov [#allocation2]   ;;  %s13_s8 = int_to_ptr.hbm [resolvable:$true] %s12_s8 }
   0x2   :  { %s14_s10 = sshll.u32 %s137_s9, 4  ;;  %s138_s11 = smov 128   ;;  %s15_s10 = int_to_ptr.vmem [resolvable:$true] %s14_s10 }
   0x3   :  { %s139_s12 = smov 8  }
   0x4   :  { %20 = dma.hbm_to_vmem [thread:$0]  %s13_s8, 256, %s15_s10, [#allocation3], %s138_s11, %s138_s11, %s139_s12  }
   0x5   :  { %133 = dma.done.wait [#allocation3], 256  }
   0x6   :  { %134 = vsyncadd [#allocation3], 4294967040  ;;  %vm27_vm0 = vcmask 261120   ;;  %v25_v0 = vld [vmem:[#allocation2] sm:$0xff]  ;;  %v26_v2 = vld [vmem:[#allocation2 + $0x8] sm:$0xff]  ;;  %s140_s0 = smov [#allocation5]  }
   0x7   :  { %v28_v1 = vsel %vm27_vm0, %v25_v0, -inf  ;;  %v31_v3 = vsel %vm27_vm0, %v26_v2, -inf  ;;  %s58_s13 = sshll.u32 %s140_s0, 4  ;;  %s60_s16 = sshll.u32 %s170_s1, 4  ;;  %s59_s13 = int_to_ptr.vmem [resolvable:$true] %s58_s13  ;;  %s61_s16 = int_to_ptr.hbm [resolvable:$true] %s60_s16 }
   0x8   :  { %29 = vmax.xlane.f32.xlu0 %v28_v1 }
  0x10   :  { %32 = vmax.xlane.f32.xlu0 %v31_v3 }
  0x7b   :  { %v30_v4 = vpop.xlane.xlu0 %29 }
  0x7c   :  { %v34_v5 = vsub.f32 %v25_v0, %v30_v4 }
  0x7e   :  { %v36_v6 = vmul.f32 1.442695, %v34_v5 }
  0x80   :  { %77 = vpow2.f32 %v36_v6 }
  0x83   :  { %v33_v7 = vpop.xlane.xlu0 %32 }
  0x84   :  { %v35_v8 = vsub.f32 %v26_v2, %v33_v7 }
  0x86   :  { %v78_v9 = vpop.eup %77  ;;  %v38_v10 = vmul.f32 1.442695, %v35_v8 }
  0x87   :  { %v40_v11 = vsel %vm27_vm0, %v78_v9, 0.0 }
  0x88   :  { %79 = vpow2.f32 %v38_v10  ;;  %41 = vadd.xlane.f32.xlu1 %v40_v11 }
  0x8e   :  { %v80_v12 = vpop.eup %79 }
  0x8f   :  { %v43_v13 = vsel %vm27_vm0, %v80_v12, 0.0 }
  0x90   :  { %44 = vadd.xlane.f32.xlu1 %v43_v13 }
  0xfb   :  { %v42_v14 = vpop.xlane.xlu1 %41 }
  0xfc   :  { %81 = vlog2.f32 %v42_v14 }
 0x102   :  { %v82_v15 = vpop.eup %81 }
 0x103   :  { %v47_v16 = vmul.f32 0.6931472, %v82_v15  ;;  %v45_v17 = vpop.xlane.xlu1 %44 }
 0x104   :  { %83 = vlog2.f32 %v45_v17 }
 0x105   :  { %v50_v18 = vsub.f32 %v34_v5, %v47_v16 }
 0x107   :  { %52 = vst.msk [vmem:[#allocation5] sm:$0xff] %vm27_vm0, %v50_v18 }
 0x10a   :  { %v84_v19 = vpop.eup %83 }
 0x10b   :  { %v49_v20 = vmul.f32 0.6931472, %v84_v19 }
 0x10d   :  { %v51_v21 = vsub.f32 %v35_v8, %v49_v20 }
 0x10f   :  { %53 = vst.msk [vmem:[#allocation5 + $0x8] sm:$0xff] %vm27_vm0, %v51_v21 }
 0x110   :  { %66 = dma.vmem_to_hbm [thread:$0]  %s59_s13, 256, %s61_s16, [#allocation4], %s138_s11, %s138_s11, %s139_s12  }
 0x111   :  { %135 = dma.done.wait [#allocation4], 256  }
 0x112   :  { %136 = vsyncadd [#allocation4], 4294967040 }
 0x113   :  { %71 = vsyncpa [#allocation3], 1 }
 0x114   :  { %72 = vsyncpa [#allocation4], 1 }

</bundles_post_ra>
